<compile_context>
chip_gen: v7x
topology: tpu7x:2x2x1
jax: 0.10.0
libtpu: 0.0.40
codegen_flags: <defaults>
</compile_context>

<pallas_src>
import functools
import math

import jax
import jax.numpy as jnp
from jax.experimental import pallas as pl
from jax.experimental.pallas import tpu as pltpu

_LANE = 128
_SUBLANE = 8
# Keep the resident-gallery working set comfortably under v7x's 64 MiB/TC.
_RESIDENT_BUDGET = 40 * 1024 * 1024


def _round_up(x, m):
    return ((x + m - 1) // m) * m


def _vmem_need_bytes(tm, tn, d_pad, nk, bytes_per_feat):
    """Rough VMEM budget for one grid step (buffers + live temporaries)."""
    gal_bufs = 1 if nk == 1 else 2                 # Buffered(1) when resident
    gallery = gal_bufs * d_pad * tn * bytes_per_feat      # -2 * x^T block(s)
    x_blocks = 2 * tm * d_pad * bytes_per_feat            # query rows (2 bufs)
    row_vecs = 2 * 2 * _SUBLANE * tn * 4                  # sq_row + trow
    col_vecs = 6 * tm * _LANE * 4                         # sq_col + tcol + out
    scratch = 2 * tm * _LANE * 4                          # ap/an accumulators
    temps = 5 * tm * tn * 4                               # gram/dist2/selects
    return gallery + x_blocks + row_vecs + col_vecs + scratch + temps


def _select_tiles(n, d_pad, block_rows, bytes_per_feat):
    tm = min(_round_up(block_rows, _SUBLANE), _round_up(n, _SUBLANE))
    n_pad = _round_up(n, tm)
    # Prefer the resident-gallery layout (single column block).
    if _vmem_need_bytes(tm, n_pad, d_pad, 1, bytes_per_feat) <= _RESIDENT_BUDGET:
        return tm, n_pad, n_pad
    # Column-tiled fallback: re-stream the gallery in TN-wide slabs per row
    # block (needed on v7x's 64 MiB VMEM / v5e's small default scoped limit).
    tn = 2048
    while tn > 256 and _vmem_need_bytes(tm, tn, d_pad, 2,
                                        bytes_per_feat) > _RESIDENT_BUDGET:
        tn //= 2
    n_pad = _round_up(n, math.lcm(tm, tn))
    return tm, tn, n_pad


def _triplet_hard_kernel(sqcol_ref, x_ref, xt_ref, sqrow_ref, tcol_ref,
                         trow_ref, out_ref, ap_ref, an_ref, *, margin):
    k = pl.program_id(1)

    @pl.when(k == 0)
    def _init():
        ap_ref[...] = jnp.full(ap_ref.shape, -1e30, jnp.float32)
        an_ref[...] = jnp.full(an_ref.shape, 1e30, jnp.float32)

    # Gram block on the MXU; the gallery is pre-transposed and pre-scaled
    # by -2, so dist2 = ||a||^2 + ||b||^2 + a . (-2 b).
    gram = jnp.dot(x_ref[...], xt_ref[...],
                   preferred_element_type=jnp.float32)        # (TM, TN)
    dist2 = sqcol_ref[...] + sqrow_ref[...] + gram            # (TM, TN)

    same = tcol_ref[...] == trow_ref[...]                     # (TM, TN)

    # Hard mining over squared distances (sqrt is monotone).  Padded gallery
    # columns carry label max+1 (never a positive) and a +1e30 row norm
    # (never the hard negative), so no extra validity mask is needed.
    ap_ref[...] = jnp.maximum(
        ap_ref[...],
        jnp.max(jnp.where(same, dist2, jnp.float32(-1e30)),
                axis=1, keepdims=True))
    an_ref[...] = jnp.minimum(
        an_ref[...],
        jnp.min(jnp.where(same, jnp.float32(1e30), dist2),
                axis=1, keepdims=True))

    @pl.when(k == pl.num_programs(1) - 1)
    def _finalize():
        dist_ap = jnp.sqrt(jnp.maximum(ap_ref[...], jnp.float32(1e-12)))
        dist_an = jnp.sqrt(jnp.maximum(an_ref[...], jnp.float32(1e-12)))
        # MarginRankingLoss with y = 1 (per-row hinge; mean in the wrapper).
        out_ref[...] = jnp.maximum(dist_ap - dist_an + jnp.float32(margin),
                                   0.0)


def triplet_hard_loss(inputs, targets, margin=0.5, block_rows=256,
                      use_bf16_gram=False, _tile_override=None):
    """inputs: (N, D) float features; targets: (N,) integer labels (>= 0)."""
    n, d = inputs.shape

    d_pad = _round_up(d, _LANE)                       # lane-dense feature axis
    feat_dtype = jnp.bfloat16 if use_bf16_gram else jnp.float32
    bpf = 2 if use_bf16_gram else 4

    if _tile_override is not None:
        tm, tn = _tile_override
        n_pad = _round_up(n, math.lcm(tm, tn))
    else:
        tm, tn, n_pad = _select_tiles(n, d_pad, block_rows, bpf)
    ni, nk = n_pad // tm, n_pad // tn

    # Zero-pad features (zeros do not change Gram / norms of real rows).
    x32 = jnp.zeros((n_pad, d_pad), jnp.float32).at[:n, :d].set(
        inputs.astype(jnp.float32))

    sq = jnp.sum(x32 * x32, axis=1)                   # (Np,)
    sq_col = sq.reshape(n_pad, 1)                     # per-query ||a||^2
    # Padded gallery columns get a huge squared norm so they can never be the
    # hard negative; their label (max+1) means they can never be a positive.
    col_pad = jnp.arange(n_pad) >= n
    sq_row = jnp.where(col_pad, jnp.float32(1e30), sq).reshape(1, n_pad)

    x_feat = x32.astype(feat_dtype)                   # (Np, Dp)
    xt_neg2 = (jnp.float32(-2.0) * x32).T.astype(feat_dtype)   # (Dp, Np)

    t = targets.astype(jnp.int32)
    pad_label = jnp.max(t) + jnp.int32(1)             # never matches real label
    t_pad = jnp.full((n_pad,), pad_label, jnp.int32).at[:n].set(t)
    tcol = t_pad.reshape(n_pad, 1)
    trow = t_pad.reshape(1, n_pad)

    # Grid-invariant gallery inputs: single-buffer them when fully resident
    # (their block index never changes, so double-buffering only wastes VMEM).
    gal_kwargs = dict(pipeline_mode=pl.Buffered(1)) if nk == 1 else {}

    need = _vmem_need_bytes(tm, tn, d_pad, nk, bpf)
    vmem_limit = int(min(max(int(need * 1.3), 32 * 1024 * 1024),
                         100 * 1024 * 1024))

    kernel = functools.partial(_triplet_hard_kernel, margin=float(margin))
    per_row = pl.pallas_call(
        kernel,
        out_shape=jax.ShapeDtypeStruct((n_pad, 1), jnp.float32),
        grid=(ni, nk),
        in_specs=[
            pl.BlockSpec((tm, 1), lambda i, k: (i, 0)),          # ||a||^2 col
            pl.BlockSpec((tm, d_pad), lambda i, k: (i, 0)),      # query rows
            pl.BlockSpec((d_pad, tn), lambda i, k: (0, k),       # -2 * x^T
                         **gal_kwargs),
            pl.BlockSpec((1, tn), lambda i, k: (0, k),           # ||b||^2 row
                         **gal_kwargs),
            pl.BlockSpec((tm, 1), lambda i, k: (i, 0)),          # labels (col)
            pl.BlockSpec((1, tn), lambda i, k: (0, k),           # labels (row)
                         **gal_kwargs),
        ],
        out_specs=pl.BlockSpec((tm, 1), lambda i, k: (i, 0)),
        scratch_shapes=[pltpu.VMEM((tm, 1), jnp.float32),        # hard-pos d2
                        pltpu.VMEM((tm, 1), jnp.float32)],       # hard-neg d2
        compiler_params=pltpu.CompilerParams(
            dimension_semantics=("parallel", "arbitrary"),
            vmem_limit_bytes=vmem_limit),
    )(sq_col, x_feat, xt_neg2, sq_row, tcol, trow)

    # reduction='mean' over the real rows only.
    return jnp.sum(per_row[:n, 0]) / jnp.float32(n)


def _reference_triplet_hard_loss(inputs, targets, margin=0.5):
    """Pure-JAX reference mirroring the PyTorch module."""
    x = inputs.astype(jnp.float32)
    sq = jnp.sum(x * x, axis=1, keepdims=True)
    dist2 = sq + sq.T - 2.0 * (x @ x.T)
    dist = jnp.sqrt(jnp.maximum(dist2, 1e-12))
    mask = targets[:, None] == targets[None, :]
    dist_ap = jnp.max(jnp.where(mask, dist, -jnp.inf), axis=1)
    dist_an = jnp.min(jnp.where(mask, jnp.inf, dist), axis=1)
    return jnp.mean(jnp.maximum(dist_ap - dist_an + margin, 0.0))


if __name__ == "__main__":
    key0, key1 = jax.random.split(jax.random.PRNGKey(0))

    # 1) Small smoke test: resident-gallery path (single column block,
    #    Buffered(1) gallery).
    n, d = 8, 32
    inputs = jax.random.normal(key0, (n, d), dtype=jnp.float32)
    targets = jnp.array([0, 0, 1, 1, 0, 1, 0, 1], dtype=jnp.int32)
    loss = triplet_hard_loss(inputs, targets, margin=0.5)
    jax.block_until_ready(loss)
    ref = _reference_triplet_hard_loss(inputs, targets, margin=0.5)
    assert jnp.allclose(loss, ref, rtol=1e-4, atol=1e-4), (loss, ref)

    # 2) Column-tiled accumulator path + row/column padding (forced small
    #    tiles so the k-axis reduction and pad handling are exercised).
    n2, d2 = 200, 32
    inputs2 = jax.random.normal(key1, (n2, d2), dtype=jnp.float32)
    targets2 = (jnp.arange(n2) % 7).astype(jnp.int32)
    loss2 = triplet_hard_loss(inputs2, targets2, margin=0.5,
                              _tile_override=(8, 128))
    jax.block_until_ready(loss2)
    ref2 = _reference_triplet_hard_loss(inputs2, targets2, margin=0.5)
    assert jnp.allclose(loss2, ref2, rtol=1e-4, atol=1e-4), (loss2, ref2)

    print("KERNEL_OK")
</pallas_src>

<mosaic_0001>
module attributes {stable_mosaic.version = 11 : i64} {
  func.func @_triplet_hard_kernel(%arg0: i32, %arg1: i32, %arg2: memref<8x1xf32, #tpu.memory_space<vmem>>, %arg3: memref<8x128xf32, #tpu.memory_space<vmem>>, %arg4: memref<128x8xf32, #tpu.memory_space<vmem>>, %arg5: memref<1x8xf32, #tpu.memory_space<vmem>>, %arg6: memref<8x1xi32, #tpu.memory_space<vmem>>, %arg7: memref<1x8xi32, #tpu.memory_space<vmem>>, %arg8: memref<8x1xf32, #tpu.memory_space<vmem>>, %arg9: memref<8x1xf32, #tpu.memory_space<vmem>>, %arg10: memref<8x1xf32, #tpu.memory_space<vmem>>) attributes {dimension_semantics = [#tpu.dimension_semantics<parallel>, #tpu.dimension_semantics<arbitrary>], iteration_bounds = array<i64: 1, 1>, scalar_prefetch = 0 : i64, scratch_operands = 2 : i64, tpu.core_type = #tpu.core_type<tc>, window_params = [{transform_indices = @transform_0, window_bounds = array<i64: 8, 1>}, {transform_indices = @transform_1, window_bounds = array<i64: 8, 128>}, {pipeline_mode = #tpu.pipeline_mode<synchronous>, transform_indices = @transform_2, window_bounds = array<i64: 128, 8>}, {pipeline_mode = #tpu.pipeline_mode<synchronous>, transform_indices = @transform_3, window_bounds = array<i64: 1, 8>}, {transform_indices = @transform_4, window_bounds = array<i64: 8, 1>}, {pipeline_mode = #tpu.pipeline_mode<synchronous>, transform_indices = @transform_5, window_bounds = array<i64: 1, 8>}, {transform_indices = @transform_6, window_bounds = array<i64: 8, 1>}]} {
    %c0_i32 = arith.constant 0 : i32
    %0 = arith.cmpi eq, %arg1, %c0_i32 : i32
    %1 = arith.extui %0 : i1 to i32
    %c0_i32_0 = arith.constant 0 : i32
    %2 = arith.cmpi ne, %1, %c0_i32_0 : i32
    scf.if %2 {
      %cst_26 = arith.constant -1.000000e+30 : f32
      %34 = vector.broadcast %cst_26 : f32 to vector<8x1xf32>
      %c0_27 = arith.constant 0 : index
      %c0_28 = arith.constant 0 : index
      %35 = vector.load %arg9[%c0_27, %c0_28] : memref<8x1xf32, #tpu.memory_space<vmem>>, vector<8x1xf32>
      tpu.vector_store %arg9[%c0_27, %c0_28], %34 {strides = array<i32>} : memref<8x1xf32, #tpu.memory_space<vmem>>, vector<8x1xf32>,
      %cst_29 = arith.constant 1.000000e+30 : f32
      %36 = vector.broadcast %cst_29 : f32 to vector<8x1xf32>
      %c0_30 = arith.constant 0 : index
      %c0_31 = arith.constant 0 : index
      %37 = vector.load %arg10[%c0_30, %c0_31] : memref<8x1xf32, #tpu.memory_space<vmem>>, vector<8x1xf32>
      tpu.vector_store %arg10[%c0_30, %c0_31], %36 {strides = array<i32>} : memref<8x1xf32, #tpu.memory_space<vmem>>, vector<8x1xf32>,
    } else {
    }
    %c0 = arith.constant 0 : index
    %c0_1 = arith.constant 0 : index
    %3 = vector.load %arg3[%c0, %c0_1] : memref<8x128xf32, #tpu.memory_space<vmem>>, vector<8x128xf32>
    %c0_2 = arith.constant 0 : index
    %c0_3 = arith.constant 0 : index
    %4 = vector.load %arg4[%c0_2, %c0_3] : memref<128x8xf32, #tpu.memory_space<vmem>>, vector<128x8xf32>
    %cst = arith.constant dense<0.000000e+00> : vector<8x8xf32>
    %5 = tpu.matmul %3, %4, %cst {dimension_numbers = #tpu.dot_dimension_numbers<[1], [0], [0], [1], [0, 0, 1, 1], [], []>} : vector<8x128xf32>, vector<128x8xf32>, vector<8x8xf32> -> vector<8x8xf32>
    %c0_4 = arith.constant 0 : index
    %c0_5 = arith.constant 0 : index
    %6 = vector.load %arg2[%c0_4, %c0_5] : memref<8x1xf32, #tpu.memory_space<vmem>>, vector<8x1xf32>
    %c0_6 = arith.constant 0 : index
    %c0_7 = arith.constant 0 : index
    %7 = vector.load %arg5[%c0_6, %c0_7] : memref<1x8xf32, #tpu.memory_space<vmem>>, vector<1x8xf32>
    %8 = vector.broadcast %6 : vector<8x1xf32> to vector<8x8xf32>
    %9 = vector.broadcast %7 : vector<1x8xf32> to vector<8x8xf32>
    %10 = arith.addf %8, %9 : vector<8x8xf32>
    %11 = arith.addf %10, %5 : vector<8x8xf32>
    %c0_8 = arith.constant 0 : index
    %c0_9 = arith.constant 0 : index
    %12 = vector.load %arg6[%c0_8, %c0_9] : memref<8x1xi32, #tpu.memory_space<vmem>>, vector<8x1xi32>
    %c0_10 = arith.constant 0 : index
    %c0_11 = arith.constant 0 : index
    %13 = vector.load %arg7[%c0_10, %c0_11] : memref<1x8xi32, #tpu.memory_space<vmem>>, vector<1x8xi32>
    %14 = vector.broadcast %12 : vector<8x1xi32> to vector<8x8xi32>
    %15 = vector.broadcast %13 : vector<1x8xi32> to vector<8x8xi32>
    %16 = arith.cmpi eq, %14, %15 : vector<8x8xi32>
    %c0_12 = arith.constant 0 : index
    %c0_13 = arith.constant 0 : index
    %17 = vector.load %arg9[%c0_12, %c0_13] : memref<8x1xf32, #tpu.memory_space<vmem>>, vector<8x1xf32>
    %cst_14 = arith.constant -1.000000e+30 : f32
    %18 = vector.broadcast %cst_14 : f32 to vector<8x8xf32>
    %19 = arith.select %16, %11, %18 : vector<8x8xi1>, vector<8x8xf32>
    %cst_15 = arith.constant dense<0xFF800000> : vector<8xf32>
    %20 = vector.multi_reduction <maximumf>, %19, %cst_15 [1] : vector<8x8xf32> to vector<8xf32>
    %21 = vector.shape_cast %20 : vector<8xf32> to vector<8x1xf32>
    %22 = arith.maximumf %17, %21 : vector<8x1xf32>
    %c0_16 = arith.constant 0 : index
    %c0_17 = arith.constant 0 : index
    %23 = vector.load %arg9[%c0_16, %c0_17] : memref<8x1xf32, #tpu.memory_space<vmem>>, vector<8x1xf32>
    tpu.vector_store %arg9[%c0_16, %c0_17], %22 {strides = array<i32>} : memref<8x1xf32, #tpu.memory_space<vmem>>, vector<8x1xf32>,
    %c0_18 = arith.constant 0 : index
    %c0_19 = arith.constant 0 : index
    %24 = vector.load %arg10[%c0_18, %c0_19] : memref<8x1xf32, #tpu.memory_space<vmem>>, vector<8x1xf32>
    %cst_20 = arith.constant 1.000000e+30 : f32
    %25 = vector.broadcast %cst_20 : f32 to vector<8x8xf32>
    %26 = arith.select %16, %25, %11 : vector<8x8xi1>, vector<8x8xf32>
    %cst_21 = arith.constant dense<0x7F800000> : vector<8xf32>
    %27 = vector.multi_reduction <minimumf>, %26, %cst_21 [1] : vector<8x8xf32> to vector<8xf32>
    %28 = vector.shape_cast %27 : vector<8xf32> to vector<8x1xf32>
    %29 = arith.minimumf %24, %28 : vector<8x1xf32>
    %c0_22 = arith.constant 0 : index
    %c0_23 = arith.constant 0 : index
    %30 = vector.load %arg10[%c0_22, %c0_23] : memref<8x1xf32, #tpu.memory_space<vmem>>, vector<8x1xf32>
    tpu.vector_store %arg10[%c0_22, %c0_23], %29 {strides = array<i32>} : memref<8x1xf32, #tpu.memory_space<vmem>>, vector<8x1xf32>,
    %c0_i32_24 = arith.constant 0 : i32
    %31 = arith.cmpi eq, %arg1, %c0_i32_24 : i32
    %32 = arith.extui %31 : i1 to i32
    %c0_i32_25 = arith.constant 0 : i32
    %33 = arith.cmpi ne, %32, %c0_i32_25 : i32
    scf.if %33 {
      %c0_26 = arith.constant 0 : index
      %c0_27 = arith.constant 0 : index
      %34 = vector.load %arg9[%c0_26, %c0_27] : memref<8x1xf32, #tpu.memory_space<vmem>>, vector<8x1xf32>
      %cst_28 = arith.constant 9.99999996E-13 : f32
      %35 = vector.broadcast %cst_28 : f32 to vector<8x1xf32>
      %36 = arith.maximumf %34, %35 : vector<8x1xf32>
      %37 = math.sqrt %36 : vector<8x1xf32>
      %c0_29 = arith.constant 0 : index
      %c0_30 = arith.constant 0 : index
      %38 = vector.load %arg10[%c0_29, %c0_30] : memref<8x1xf32, #tpu.memory_space<vmem>>, vector<8x1xf32>
      %cst_31 = arith.constant 9.99999996E-13 : f32
      %39 = vector.broadcast %cst_31 : f32 to vector<8x1xf32>
      %40 = arith.maximumf %38, %39 : vector<8x1xf32>
      %41 = math.sqrt %40 : vector<8x1xf32>
      %42 = arith.subf %37, %41 : vector<8x1xf32>
      %cst_32 = arith.constant 5.000000e-01 : f32
      %43 = vector.broadcast %cst_32 : f32 to vector<8x1xf32>
      %44 = arith.addf %42, %43 : vector<8x1xf32>
      %cst_33 = arith.constant 0.000000e+00 : f32
      %45 = vector.broadcast %cst_33 : f32 to vector<8x1xf32>
      %46 = arith.maximumf %44, %45 : vector<8x1xf32>
      %c0_34 = arith.constant 0 : index
      %c0_35 = arith.constant 0 : index
      %47 = vector.load %arg8[%c0_34, %c0_35] : memref<8x1xf32, #tpu.memory_space<vmem>>, vector<8x1xf32>
      tpu.vector_store %arg8[%c0_34, %c0_35], %46 {strides = array<i32>} : memref<8x1xf32, #tpu.memory_space<vmem>>, vector<8x1xf32>,
    } else {
    }
    return
  }
  func.func @transform_0(%arg0: i32, %arg1: i32) -> (i32, i32) {
    %c0_i32 = arith.constant 0 : i32
    %c0_i32_0 = arith.constant 0 : i32
    return %arg0, %c0_i32 : i32, i32
  }
  func.func @transform_1(%arg0: i32, %arg1: i32) -> (i32, i32) {
    %c0_i32 = arith.constant 0 : i32
    %c0_i32_0 = arith.constant 0 : i32
    return %arg0, %c0_i32 : i32, i32
  }
  func.func @transform_2(%arg0: i32, %arg1: i32) -> (i32, i32) {
    %c0_i32 = arith.constant 0 : i32
    %c0_i32_0 = arith.constant 0 : i32
    return %c0_i32, %arg1 : i32, i32
  }
  func.func @transform_3(%arg0: i32, %arg1: i32) -> (i32, i32) {
    %c0_i32 = arith.constant 0 : i32
    %c0_i32_0 = arith.constant 0 : i32
    return %c0_i32, %arg1 : i32, i32
  }
  func.func @transform_4(%arg0: i32, %arg1: i32) -> (i32, i32) {
    %c0_i32 = arith.constant 0 : i32
    %c0_i32_0 = arith.constant 0 : i32
    return %arg0, %c0_i32 : i32, i32
  }
  func.func @transform_5(%arg0: i32, %arg1: i32) -> (i32, i32) {
    %c0_i32 = arith.constant 0 : i32
    %c0_i32_0 = arith.constant 0 : i32
    return %c0_i32, %arg1 : i32, i32
  }
  func.func @transform_6(%arg0: i32, %arg1: i32) -> (i32, i32) {
    %c0_i32 = arith.constant 0 : i32
    %c0_i32_0 = arith.constant 0 : i32
    return %arg0, %c0_i32 : i32, i32
  }
}

</mosaic_0001>

<bundles_post_ra>
// kernel: tpu_custom_call.1
= control target key start
LH: loop header
LB: loop body
LE: loop exit
PB: predicated region body
PF: predicated region fallthrough
CT: control target
= control target key end

     0   :  { %v276_v0 = vmov 0.0|0.0   ;;  %vm277_vm0 = vmmov 0   ;;  %v278_v4 = vmov 0.0   ;;  %v279_v7 = vmov 0   ;;  %s388_s2 = inlined_call_operand.vmem [shape: f32[128,8], index: 2, kind: input, shape index: {}]   ;;  %s389_s0 = inlined_call_operand.vmem [shape: f32[8,1], index: 0, kind: input, shape index: {}]   ;;  %s390_s4 = inlined_call_operand.vmem [shape: s32[8,1], index: 4, kind: input, shape index: {}]   ;;  %s391_s1 = inlined_call_operand.vmem [shape: f32[8,128], index: 1, kind: input, shape index: {}]   ;;  %s392_s3 = inlined_call_operand.vmem [shape: f32[1,8], index: 3, kind: input, shape index: {}]   ;;  %s393_s5 = inlined_call_operand.vmem [shape: s32[1,8], index: 5, kind: input, shape index: {}]   ;;  %s394_s6 = inlined_call_operand.vmem [shape: f32[8,1], index: 6, kind: output, shape index: {}]  }
   0x1   :  { %241 = vmatprep.subr.bf16.mxu0 %v276_v0  ;;  %v31_v1 = vld [vmem:[%s388_s2] sm:$0xff]  ;;  %v32_v2 = vld [vmem:[%s388_s2 + $0x8] sm:$0xff]  ;;  %v33_v3 = vld [vmem:[%s388_s2 + $0x10] sm:$0xff]  ;;  %238 = vmatprep.mubr.msk.f32.mxu0 %vm277_vm0, %v278_v4  ;;  %vm27_vm1 = vcmask 7168   ;;  %v280_v30 = vmov -1e+30  }
   0x2   :  { %v242_v5 = vpack.c.bf16 %v32_v2, %v31_v1  ;;  %v34_v6 = vld [vmem:[%s388_s2 + $0x18] sm:$0xff]  ;;  %271 = vset.pattern.permute.xlu0 %v279_v7  ;;  %v35_v9 = vld [vmem:[%s388_s2 + $0x20] sm:$0xff]  ;;  %v36_v10 = vld [vmem:[%s388_s2 + $0x28] sm:$0xff]  ;;  %28 = vst.msk [vmem:[#allocation2] sm:$0xff] %vm27_vm1, %v280_v30  ;;  %vm144_vm2 = vcmask 64512  }
   0x3   :  { %v245_v8 = vpack.c.bf16 %v34_v6, %v33_v3  ;;  %v117_v11 = vld [vmem:[%s389_s0] sm:$0xff]  ;;  %v248_v12 = vpack.c.bf16 %v36_v10, %v35_v9  ;;  %v37_v14 = vld [vmem:[%s388_s2 + $0x30] sm:$0xff]  ;;  %v38_v15 = vld [vmem:[%s388_s2 + $0x38] sm:$0xff]  ;;  %v281_v43 = vmov 1e+30  }
   0x4   :  { %243 = vmatpush3.bf16.msra.mxu0 %v242_v5  ;;  %121 = vperm.xlu0 %271, %v117_v11   ;;  %v132_v13 = vld [vmem:[%s390_s4] sm:$0xff]  ;;  %v251_v16 = vpack.c.bf16 %v38_v15, %v37_v14  ;;  %v40_v18 = vld [vmem:[%s388_s2 + $0x48] sm:$0xff]  ;;  %v41_v20 = vld [vmem:[%s388_s2 + $0x50] sm:$0xff]  ;;  %29 = vst.msk [vmem:[#allocation3] sm:$0xff] %vm27_vm1, %v281_v43 }
   0x5   :  { %244 = vmatprep.subr.bf16.mxu0 %v276_v0  ;;  %v39_v17 = vld [vmem:[%s388_s2 + $0x40] sm:$0xff]  ;;  %v42_v21 = vld [vmem:[%s388_s2 + $0x58] sm:$0xff]  ;;  %v44_v24 = vld [vmem:[%s388_s2 + $0x68] sm:$0xff] }
   0x6   :  { %v254_v19 = vpack.c.bf16 %v40_v18, %v39_v17  ;;  %v257_v22 = vpack.c.bf16 %v42_v21, %v41_v20  ;;  %v43_v23 = vld [vmem:[%s388_s2 + $0x60] sm:$0xff]  ;;  %v45_v26 = vld [vmem:[%s388_s2 + $0x70] sm:$0xff]  ;;  %v46_v27 = vld [vmem:[%s388_s2 + $0x78] sm:$0xff] }
   0x7   :  { %v260_v25 = vpack.c.bf16 %v44_v24, %v43_v23  ;;  %v263_v28 = vpack.c.bf16 %v46_v27, %v45_v26  ;;  %v30_v29 = vld [vmem:[%s391_s1] sm:$0xff] }
   0x8   :  { %246 = vmatpush3.bf16.msra.mxu0 %v245_v8  ;;  %135 = vperm.xlu0 %271, %v132_v13   ;;  %v187_v32 = vld [vmem:[%s392_s3] ss:$0 sm:$0xff] }
   0x9   :  { %247 = vmatprep.subr.bf16.mxu0 %v276_v0  ;;  %v188_v34 = vld [vmem:[%s393_s5] ss:$0 sm:$0xff]  ;;  %v142_v44 = vld [vmem:[#allocation2] sm:$0xff] }
   0xb   :  { %v151_v47 = vld [vmem:[#allocation3] sm:$0xff] }
   0xc   :  { %249 = vmatpush3.bf16.msra.mxu0 %v248_v12 }
   0xd   :  { %250 = vmatprep.subr.bf16.mxu0 %v276_v0 }
  0x10   :  { %252 = vmatpush3.bf16.msra.mxu0 %v251_v16 }
  0x11   :  { %253 = vmatprep.subr.bf16.mxu0 %v276_v0 }
  0x14   :  { %255 = vmatpush3.bf16.msra.mxu0 %v254_v19 }
  0x15   :  { %256 = vmatprep.subr.bf16.mxu0 %v276_v0 }
  0x18   :  { %258 = vmatpush3.bf16.msra.mxu0 %v257_v22 }
  0x19   :  { %259 = vmatprep.subr.bf16.mxu0 %v276_v0 }
  0x1c   :  { %261 = vmatpush3.bf16.msra.mxu0 %v260_v25 }
  0x1d   :  { %262 = vmatprep.subr.bf16.mxu0 %v276_v0 }
  0x20   :  { %264 = vmatpush3.bf16.msra.mxu0 %v263_v28 }
  0x23   :  { %239 = vmatmul.mubr.f32.vlgmr.msra.gmra.mrb[0].mxu0 %v30_v29 }
  0x83   :  { %v122_v31 = vpop.permute.xlu0 %121 }
  0x84   :  { %v130_v33 = vadd.f32 %v187_v32, %v122_v31 }
  0x87   :  { %v136_v35 = vpop.permute.xlu0 %135 }
  0x88   :  { %vm141_vm3 = vcmp.eq.s32.totalorder %v136_v35, %v188_v34 }
  0xf6   :  { %v113_v36 = vpop.f32.mrb[0].mxu0 }
  0xf7   :  { %v131_v37 = vadd.f32 %v130_v33, %v113_v36  ;;  %v240_v38 = vpop.f32.mrb[1].mxu0 }
  0xf9   :  { %v143_v39 = vsel %vm141_vm3, %v131_v37, -1e+30  ;;  %v152_v41 = vsel %vm141_vm3, 1e+30, %v131_v37 }
  0xfa   :  { %v145_v40 = vsel %vm144_vm2, %v143_v39, -inf  ;;  %v153_v42 = vsel %vm144_vm2, %v152_v41, inf }
  0xfb   :  { %146 = vmax.xlane.f32.xlu1 %v145_v40 }
  0xff   :  { %154 = vmin.xlane.f32.xlu1 %v153_v42 }
 0x188   :  { %v147_v45 = vpop.xlane.xlu1 %146 }
 0x189   :  { %v148_v46 = vmax.f32 %v142_v44, %v147_v45 }
 0x18b   :  { %150 = vst.msk [vmem:[#allocation2] sm:$0xff] %vm27_vm1, %v148_v46 }
 0x18c   :  { %v155_v48 = vpop.xlane.xlu1 %154 }
 0x18d   :  { %v156_v49 = vmin.f32 %v151_v47, %v155_v48 }
 0x18f   :  { %157 = vst.msk [vmem:[#allocation3] sm:$0xff] %vm27_vm1, %v156_v49 }
 0x192   :  { %v161_v50 = vld [vmem:[#allocation2] sm:$0xff] }
 0x193   :  { %v162_v51 = vmax.f32 %v161_v50, 1e-12 }
 0x195   :  { %272 = vrsqrt.f32 %v162_v51  ;;  %vm165_vm4 = vcmp.eq.f32.partialorder %v162_v51, inf  ;;  %v168_v59 = vand.u32 2147483648, %v162_v51  ;;  %vm167_vm6 = vcmp.eq.f32.partialorder %v162_v51, 0.0 }
 0x196   :  { %v170_v52 = vld [vmem:[#allocation3] sm:$0xff] }
 0x197   :  { %v171_v53 = vmax.f32 %v170_v52, 1e-12 }
 0x199   :  { %274 = vrsqrt.f32 %v171_v53  ;;  %vm174_vm5 = vcmp.eq.f32.partialorder %v171_v53, inf  ;;  %v177_v60 = vand.u32 2147483648, %v171_v53  ;;  %vm176_vm7 = vcmp.eq.f32.partialorder %v171_v53, 0.0 }
 0x19f   :  { %v273_v54 = vpop.eup %272 }
 0x1a0   :  { %v164_v55 = vmul.f32 %v273_v54, %v162_v51 }
 0x1a2   :  { %v166_v57 = vsel %vm165_vm4, %v162_v51, %v164_v55 }
 0x1a3   :  { %v275_v56 = vpop.eup %274  ;;  %v169_v62 = vsel %vm167_vm6, %v168_v59, %v166_v57 }
 0x1a4   :  { %v173_v58 = vmul.f32 %v275_v56, %v171_v53 }
 0x1a6   :  { %v175_v61 = vsel %vm174_vm5, %v171_v53, %v173_v58 }
 0x1a7   :  { %v178_v63 = vsel %vm176_vm7, %v177_v60, %v175_v61 }
 0x1a8   :  { %v179_v0 = vsub.f32 %v169_v62, %v178_v63 }
 0x1aa   :  { %v180_v1 = vadd.f32 0.5, %v179_v0 }
 0x1ac   :  { %v181_v2 = vmax.f32 %v180_v1, 0.0 }
 0x1ae   :  { %182 = vst.msk [vmem:[%s394_s6] sm:$0xff] %vm27_vm1, %v181_v2 }

</bundles_post_ra>
